<compile_context>
chip_gen: v6e
topology: v6e:2x2x1
jax: 0.10.0
libtpu: 0.0.40
codegen_flags: <defaults>
</compile_context>

<pallas_src>
import functools

import jax
import jax.numpy as jnp
from jax.experimental import pallas as pl
from jax.experimental.pallas import tpu as pltpu


def projector_kernel(x_ref, t_ref, wqk_ref, o_ref, *, mxu_dtype):
    """One grid step processes a block of Bblk batches."""
    x = x_ref[...]          # (Bblk, N, C)  f32
    t = t_ref[...]          # (Bblk, M, C)  f32
    wqk = wqk_ref[...]      # (Bblk, 2, C, C)  f32 (Wq stacked with Wk)
    wq = wqk[:, 0]          # (Bblk, C, C)
    wk = wqk[:, 1]          # (Bblk, C, C)

    exact_f32 = jnp.dtype(mxu_dtype) == jnp.dtype(jnp.float32)
    xm = x.astype(mxu_dtype)
    tm = t.astype(mxu_dtype)

    # A = x @ Wq, B = T @ Wk  (batched matmuls on the MXU, f32 accumulation)
    a = jnp.einsum("bnc,bcd->bnd", xm, wq.astype(mxu_dtype),
                   preferred_element_type=jnp.float32)
    bm = jnp.einsum("bmc,bcd->bmd", tm, wk.astype(mxu_dtype),
                    preferred_element_type=jnp.float32)

    # S = A @ B^T expressed directly as a contraction over the last axes —
    # avoids an explicit transpose of the VMEM-resident B tile.
    s = jnp.einsum("bnd,bmd->bnm", a.astype(mxu_dtype), bm.astype(mxu_dtype),
                   preferred_element_type=jnp.float32)

    # Max-subtracted softmax along the last axis (dim=2 in the PyTorch code).
    s_max = jnp.max(s, axis=-1, keepdims=True)
    p = jnp.exp(s - s_max)
    denom = jnp.sum(p, axis=-1, keepdims=True)
    if exact_f32:
        # denom is a tiny (Bblk, N, 1) vector: the exact divide costs a
        # handful of EUP/VPU ops and keeps the whole default path full f32.
        p = p / denom
    else:
        # bf16 MXU operands already cap precision; use the (otherwise idle)
        # EUP approximate-reciprocal slot.
        p = p * pl.reciprocal(denom, approx=True)

    # out = x_in + softmax(S) @ T
    c = jnp.einsum("bnm,bmc->bnc", p.astype(mxu_dtype), tm,
                   preferred_element_type=jnp.float32)
    o_ref[...] = (x.astype(jnp.float32) + c).astype(o_ref.dtype)


def _padded_vmem_bytes(shape, itemsize=4):
    """VMEM footprint of an f32 array: last dim pads to 128 lanes, the
    second-to-last to 8 sublanes (so C=32 really costs 4x)."""
    shape = tuple(int(d) for d in shape)
    if len(shape) < 2:
        shape = (1,) * (2 - len(shape)) + shape
    lead = 1
    for d in shape[:-2]:
        lead *= d
    sub = -(-shape[-2] // 8) * 8
    lane = -(-shape[-1] // 128) * 128
    return lead * sub * lane * itemsize


def _block_vmem_footprint(bblk, N, M, C):
    """Real VMEM need of one grid step: double-buffered streamed blocks plus
    the (not double-buffered) intermediates, plus compiler-scratch margin."""
    io = (_padded_vmem_bytes((bblk, N, C))        # x
          + _padded_vmem_bytes((bblk, M, C))      # T
          + _padded_vmem_bytes((bblk, 2, C, C))   # Wq/Wk stacked
          + _padded_vmem_bytes((bblk, N, C)))     # out
    io *= 2                                       # Pallas double-buffers blocks
    inter = (_padded_vmem_bytes((bblk, N, C))     # A
             + _padded_vmem_bytes((bblk, M, C))   # B
             + 2 * _padded_vmem_bytes((bblk, N, M)))  # S, P
    return io + inter + (2 << 20)


def _hw_params():
    """(usable VMEM bytes per TensorCore, TensorCores per chip)."""
    vmem_bytes = 128 << 20    # v5e / v6e physical VMEM per core
    tensorcores = 1
    try:
        kind = jax.devices()[0].device_kind.lower()
        if "v7" in kind or "7x" in kind:
            vmem_bytes = 64 << 20   # v7x: 64 MiB per TensorCore
            tensorcores = 2
    except Exception:
        pass
    try:  # prefer the exact figure when available
        vmem_bytes = int(pltpu.get_tpu_info().vmem_capacity_bytes)
    except Exception:
        pass
    return vmem_bytes, tensorcores


def _pick_batch_block(B, N, M, C, vmem_bytes, tensorcores):
    """Largest divisor of B whose working set fits ~70% of VMEM.

    Multiple grid steps are only required when the part actually has more
    than one TensorCore (v7x); on v5e/v6e one big step amortizes the
    per-step overhead and issues one large DMA slab."""
    budget = int(vmem_bytes * 0.7)
    divisors = [d for d in range(1, B + 1) if B % d == 0]
    feasible = [d for d in divisors
                if _block_vmem_footprint(d, N, M, C) <= budget] or [1]
    # Prefer blocks that give every TensorCore an equal number of steps.
    balanced = [d for d in feasible
                if (B // d) >= tensorcores and (B // d) % tensorcores == 0]
    return max(balanced or feasible)


def projector_forward(x_in, t, wq, wk, *, batch_block=None,
                      mxu_dtype=jnp.float32):
    B, N, C = x_in.shape
    _, M, _ = t.shape
    assert t.shape[0] == B and t.shape[2] == C
    assert wq.shape == (B, C, C) and wk.shape == (B, C, C)

    vmem_bytes, tensorcores = _hw_params()
    if batch_block is None:
        batch_block = _pick_batch_block(B, N, M, C, vmem_bytes, tensorcores)
    assert B % batch_block == 0, "batch_block must divide the batch size"
    grid_b = B // batch_block

    # Single weight stream: Wq / Wk stacked along a leading axis.
    wqk = jnp.stack([wq, wk], axis=1)   # (B, 2, C, C)

    # Advisory cost hint for the XLA scheduler around the custom call.
    flops = 2 * B * (N * C * C + M * C * C + 2 * N * M * C)
    transcendentals = B * N * M              # exp
    itemsize = jnp.dtype(x_in.dtype).itemsize
    bytes_accessed = itemsize * (2 * B * N * C + B * M * C + 2 * B * C * C)
    cost = pl.CostEstimate(flops=flops, transcendentals=transcendentals,
                           bytes_accessed=bytes_accessed)

    # VMEM limit from the real per-step footprint, validated against this
    # generation's physical VMEM.
    footprint = _block_vmem_footprint(batch_block, N, M, C)
    vmem_limit = int(min(vmem_bytes, 128 << 20,
                         max(2 * footprint, 32 << 20)))

    kernel = functools.partial(projector_kernel, mxu_dtype=mxu_dtype)

    return pl.pallas_call(
        kernel,
        out_shape=jax.ShapeDtypeStruct((B, N, C), x_in.dtype),
        grid_spec=pltpu.PrefetchScalarGridSpec(
            num_scalar_prefetch=0,
            grid=(grid_b,),
            in_specs=[
                pl.BlockSpec((batch_block, N, C), lambda b: (b, 0, 0)),
                pl.BlockSpec((batch_block, M, C), lambda b: (b, 0, 0)),
                pl.BlockSpec((batch_block, 2, C, C), lambda b: (b, 0, 0, 0)),
            ],
            out_specs=pl.BlockSpec((batch_block, N, C), lambda b: (b, 0, 0)),
        ),
        compiler_params=pltpu.CompilerParams(
            dimension_semantics=("parallel",),
            vmem_limit_bytes=vmem_limit,
        ),
        cost_estimate=cost,
    )(x_in, t, wqk)


def xavier_uniform(key, shape, fan_in, fan_out, dtype=jnp.float32):
    # Matches torch.nn.init.xavier_uniform_ (gain=1).
    bound = (6.0 / (fan_in + fan_out)) ** 0.5
    return jax.random.uniform(key, shape, dtype=dtype, minval=-bound, maxval=bound)


def reference_forward(x_in, t, wq, wk):
    a = jnp.einsum("bnc,bcd->bnd", x_in, wq)
    b = jnp.einsum("bmc,bcd->bmd", t, wk)
    s = jnp.einsum("bnd,bmd->bnm", a, b)
    p = jax.nn.softmax(s, axis=2)
    c = jnp.einsum("bnm,bmc->bnc", p, t)
    return x_in + c


if __name__ == "__main__":
    batch_size = 8
    token_channels = 32   # C
    n_tokens = 8          # sequence length of x_in (N)
    m_tokens = 8          # sequence length of T (M)

    key = jax.random.PRNGKey(0)
    k_x, k_t, k_wq, k_wk = jax.random.split(key, 4)

    x_in = jax.random.normal(k_x, (batch_size, n_tokens, token_channels), jnp.float32)
    T = jax.random.normal(k_t, (batch_size, m_tokens, token_channels), jnp.float32)

    # Parameters: (B, C, C), xavier_uniform (torch's xavier on the 3-D tensor
    # uses the last two dims => fan_in = fan_out = C).
    Wq = xavier_uniform(k_wq, (batch_size, token_channels, token_channels),
                        token_channels, token_channels)
    Wk = xavier_uniform(k_wk, (batch_size, token_channels, token_channels),
                        token_channels, token_channels)

    out = projector_forward(x_in, T, Wq, Wk)   # default: full f32 path
    out = jax.block_until_ready(out)

    ref = reference_forward(x_in, T, Wq, Wk)
    assert out.shape == (batch_size, n_tokens, token_channels)
    # Default path is full f32 with an exact softmax divide -> tight tolerance.
    assert jnp.allclose(out, ref, atol=1e-5, rtol=1e-5), "mismatch vs reference"

    print("KERNEL_OK")
</pallas_src>

<mosaic_0001>
module attributes {stable_mosaic.version = 11 : i64} {
  func.func @projector_kernel(%arg0: i32, %arg1: memref<8x8x32xf32, #tpu.memory_space<vmem>>, %arg2: memref<8x8x32xf32, #tpu.memory_space<vmem>>, %arg3: memref<8x2x32x32xf32, #tpu.memory_space<vmem>>, %arg4: memref<8x8x32xf32, #tpu.memory_space<vmem>>) attributes {dimension_semantics = [#tpu.dimension_semantics<parallel>], iteration_bounds = array<i64: 1>, scalar_prefetch = 0 : i64, scratch_operands = 0 : i64, tpu.core_type = #tpu.core_type<tc>, window_params = [{transform_indices = @transform_0, window_bounds = array<i64: 8, 8, 32>}, {transform_indices = @transform_1, window_bounds = array<i64: 8, 8, 32>}, {transform_indices = @transform_2, window_bounds = array<i64: 8, 2, 32, 32>}, {transform_indices = @transform_3, window_bounds = array<i64: 8, 8, 32>}]} {
    %c0 = arith.constant 0 : index
    %c0_0 = arith.constant 0 : index
    %c0_1 = arith.constant 0 : index
    %0 = vector.load %arg1[%c0, %c0_0, %c0_1] : memref<8x8x32xf32, #tpu.memory_space<vmem>>, vector<8x8x32xf32>
    %c0_2 = arith.constant 0 : index
    %c0_3 = arith.constant 0 : index
    %c0_4 = arith.constant 0 : index
    %1 = vector.load %arg2[%c0_2, %c0_3, %c0_4] : memref<8x8x32xf32, #tpu.memory_space<vmem>>, vector<8x8x32xf32>
    %c0_5 = arith.constant 0 : index
    %c0_6 = arith.constant 0 : index
    %c0_7 = arith.constant 0 : index
    %c0_8 = arith.constant 0 : index
    %2 = vector.load %arg3[%c0_5, %c0_6, %c0_7, %c0_8] : memref<8x2x32x32xf32, #tpu.memory_space<vmem>>, vector<8x2x32x32xf32>
    %3 = vector.extract_strided_slice %2 {offsets = [0, 0, 0, 0], sizes = [8, 1, 32, 32], strides = [1, 1, 1, 1]} : vector<8x2x32x32xf32> to vector<8x1x32x32xf32>
    %4 = vector.shape_cast %3 : vector<8x1x32x32xf32> to vector<8x32x32xf32>
    %5 = vector.extract_strided_slice %2 {offsets = [0, 1, 0, 0], sizes = [8, 1, 32, 32], strides = [1, 1, 1, 1]} : vector<8x2x32x32xf32> to vector<8x1x32x32xf32>
    %6 = vector.shape_cast %5 : vector<8x1x32x32xf32> to vector<8x32x32xf32>
    "tpu.trace_start"() <{level = 10 : i32, message = "bnc,bcd->bnd"}> : () -> ()
    %cst = arith.constant dense<0.000000e+00> : vector<8x8x32xf32>
    %7 = tpu.matmul %0, %4, %cst {dimension_numbers = #tpu.dot_dimension_numbers<[2], [1], [1], [2], [0, 0, 0, 1, 1, 2], [0], [0]>} : vector<8x8x32xf32>, vector<8x32x32xf32>, vector<8x8x32xf32> -> vector<8x8x32xf32>
    "tpu.trace_stop"() : () -> ()
    "tpu.trace_start"() <{level = 10 : i32, message = "bmc,bcd->bmd"}> : () -> ()
    %cst_9 = arith.constant dense<0.000000e+00> : vector<8x8x32xf32>
    %8 = tpu.matmul %1, %6, %cst_9 {dimension_numbers = #tpu.dot_dimension_numbers<[2], [1], [1], [2], [0, 0, 0, 1, 1, 2], [0], [0]>} : vector<8x8x32xf32>, vector<8x32x32xf32>, vector<8x8x32xf32> -> vector<8x8x32xf32>
    "tpu.trace_stop"() : () -> ()
    "tpu.trace_start"() <{level = 10 : i32, message = "bnd,bmd->bnm"}> : () -> ()
    %cst_10 = arith.constant dense<0.000000e+00> : vector<8x8x8xf32>
    %9 = tpu.matmul %7, %8, %cst_10 {dimension_numbers = #tpu.dot_dimension_numbers<[2], [2], [1], [1], [0, 0, 0, 1, 1, 1], [0], [0]>} : vector<8x8x32xf32>, vector<8x8x32xf32>, vector<8x8x8xf32> -> vector<8x8x8xf32>
    "tpu.trace_stop"() : () -> ()
    %cst_11 = arith.constant dense<0xFF800000> : vector<8x8xf32>
    %10 = vector.multi_reduction <maximumf>, %9, %cst_11 [2] : vector<8x8x8xf32> to vector<8x8xf32>
    %11 = vector.shape_cast %10 : vector<8x8xf32> to vector<8x8x1xf32>
    %12 = vector.broadcast %11 : vector<8x8x1xf32> to vector<8x8x8xf32>
    %13 = arith.subf %9, %12 : vector<8x8x8xf32>
    %14 = math.exp %13 : vector<8x8x8xf32>
    %cst_12 = arith.constant dense<0.000000e+00> : vector<8x8xf32>
    %15 = vector.multi_reduction <add>, %14, %cst_12 [2] : vector<8x8x8xf32> to vector<8x8xf32>
    %16 = vector.shape_cast %15 : vector<8x8xf32> to vector<8x8x1xf32>
    %17 = vector.broadcast %16 : vector<8x8x1xf32> to vector<8x8x8xf32>
    %18 = arith.divf %14, %17 : vector<8x8x8xf32>
    "tpu.trace_start"() <{level = 10 : i32, message = "bnm,bmc->bnc"}> : () -> ()
    %cst_13 = arith.constant dense<0.000000e+00> : vector<8x8x32xf32>
    %19 = tpu.matmul %18, %1, %cst_13 {dimension_numbers = #tpu.dot_dimension_numbers<[2], [1], [1], [2], [0, 0, 0, 1, 1, 2], [0], [0]>} : vector<8x8x8xf32>, vector<8x8x32xf32>, vector<8x8x32xf32> -> vector<8x8x32xf32>
    "tpu.trace_stop"() : () -> ()
    %20 = arith.addf %0, %19 : vector<8x8x32xf32>
    %c0_14 = arith.constant 0 : index
    %c0_15 = arith.constant 0 : index
    %c0_16 = arith.constant 0 : index
    %21 = vector.load %arg4[%c0_14, %c0_15, %c0_16] : memref<8x8x32xf32, #tpu.memory_space<vmem>>, vector<8x8x32xf32>
    tpu.vector_store %arg4[%c0_14, %c0_15, %c0_16], %20 {strides = array<i32>} : memref<8x8x32xf32, #tpu.memory_space<vmem>>, vector<8x8x32xf32>,
    return
  }
  func.func @transform_0(%arg0: i32) -> (i32, i32, i32) {
    %c0_i32 = arith.constant 0 : i32
    %c0_i32_0 = arith.constant 0 : i32
    %c0_i32_1 = arith.constant 0 : i32
    return %arg0, %c0_i32, %c0_i32_0 : i32, i32, i32
  }
  func.func @transform_1(%arg0: i32) -> (i32, i32, i32) {
    %c0_i32 = arith.constant 0 : i32
    %c0_i32_0 = arith.constant 0 : i32
    %c0_i32_1 = arith.constant 0 : i32
    return %arg0, %c0_i32, %c0_i32_0 : i32, i32, i32
  }
  func.func @transform_2(%arg0: i32) -> (i32, i32, i32, i32) {
    %c0_i32 = arith.constant 0 : i32
    %c0_i32_0 = arith.constant 0 : i32
    %c0_i32_1 = arith.constant 0 : i32
    %c0_i32_2 = arith.constant 0 : i32
    return %arg0, %c0_i32, %c0_i32_0, %c0_i32_1 : i32, i32, i32, i32
  }
  func.func @transform_3(%arg0: i32) -> (i32, i32, i32) {
    %c0_i32 = arith.constant 0 : i32
    %c0_i32_0 = arith.constant 0 : i32
    %c0_i32_1 = arith.constant 0 : i32
    return %arg0, %c0_i32, %c0_i32_0 : i32, i32, i32
  }
}

</mosaic_0001>

<bundles_post_ra>
// kernel: tpu_custom_call.1
= control target key start
LH: loop header
LB: loop body
LE: loop exit
PB: predicated region body
PF: predicated region fallthrough
CT: control target
= control target key end

     0   :  { %8 = vsyncpa [#allocation3], 0  ;;  %s3478_s0 = inlined_call_operand.hbm [shape: f32[8,8,32], index: 0, kind: input, shape index: {}]   ;;  %s3479_s1 = inlined_call_operand.hbm [shape: f32[8,8,32], index: 1, kind: input, shape index: {}]   ;;  %s3480_s2 = inlined_call_operand.hbm [shape: f32[8,2,32,32], index: 2, kind: input, shape index: {}]   ;;  %s3481_s3 = inlined_call_operand.hbm [shape: f32[8,8,32], index: 3, kind: output, shape index: {}]  }
   0x1   :  { %9 = vsyncpa [#allocation6], 0 }
   0x2   :  { %10 = vsyncpa [#allocation4], 0  ;;  %s3154_s12 = smov [#allocation5]   ;;  %s3155_s14 = smov [#allocation2]  }
   0x3   :  { %s28_s13 = sshll.u32 %s3154_s12, 4  ;;  %s16_s15 = sshll.u32 %s3155_s14, 4  ;;  %s29_s13 = int_to_ptr.vmem [resolvable:$true] %s28_s13  ;;  %s17_s15 = int_to_ptr.vmem [resolvable:$true] %s16_s15 }
   0x4   :  { %s3076_s16 = scalar_lea.vmem %s29_s13, 1024  ;;  %p3081_p1 = scmp.lt.s32.totalorder %s29_s13, %s29_s13 }
   0x5   :  { %p3077_p0 = scmp.ne.s32.totalorder %s29_s13, %s3076_s16  ;;  %p3082_p2 = scmp.lt.s32.totalorder %s3076_s16, %s3076_s16 }
   0x7   :  { %p3083_p3 = por %p3082_p2, %p3081_p1 }
   0x9   :  { %p3084_p4 = pnand %p3083_p3, %p3077_p0 }
   0xb   :  { %3087 = shalt.err (!%p3084_p4)
}
   0xc   :  { %s3156_s17 = smov 128   ;;  %s3157_s18 = smov 8  }
   0xd   :  { %34 = dma.hbm_to_vmem [thread:$0]  %s3479_s1, 1024, %s29_s13, [#allocation6], %s3156_s17, %s3156_s17, %s3157_s18  }
   0xe   :  { %s3096_s21 = scalar_lea.vmem %s17_s15, 1024  ;;  %p3101_p6 = scmp.lt.s32.totalorder %s17_s15, %s17_s15 }
   0xf   :  { %p3097_p5 = scmp.ne.s32.totalorder %s17_s15, %s3096_s21  ;;  %p3102_p7 = scmp.lt.s32.totalorder %s3096_s21, %s3096_s21 }
  0x11   :  { %p3103_p8 = por %p3102_p7, %p3101_p6 }
  0x13   :  { %p3104_p9 = pnand %p3103_p8, %p3097_p5 }
  0x15   :  { %3107 = shalt.err (!%p3104_p9)
}
  0x16   :  { %22 = dma.hbm_to_vmem [thread:$0]  %s3478_s0, 1024, %s17_s15, [#allocation3], %s3156_s17, %s3156_s17, %s3157_s18  }
  0x17   :  { %s3158_s24 = smov [#allocation7]  }
  0x18   :  { %s40_s25 = sshll.u32 %s3158_s24, 4  ;;  %s41_s25 = int_to_ptr.vmem [resolvable:$true] %s40_s25 }
  0x19   :  { %s3116_s26 = scalar_lea.vmem %s41_s25, 8192  ;;  %p3121_p11 = scmp.lt.s32.totalorder %s41_s25, %s41_s25 }
  0x1a   :  { %p3117_p10 = scmp.ne.s32.totalorder %s41_s25, %s3116_s26  ;;  %p3122_p12 = scmp.lt.s32.totalorder %s3116_s26, %s3116_s26 }
  0x1c   :  { %p3123_p13 = por %p3122_p12, %p3121_p11 }
  0x1e   :  { %p3124_p0 = pnand %p3123_p13, %p3117_p10 }
  0x20   :  { %3127 = shalt.err (!%p3124_p0)
}
  0x21   :  { %46 = dma.hbm_to_vmem [thread:$0]  %s3480_s2, 8192, %s41_s25, [#allocation6], %s3156_s17, %s3156_s17, %s3157_s18  }
  0x22   :  { %3148 = dma.done.wait [#allocation3], 1024  }
  0x23   :  { %3149 = vsyncadd [#allocation3], 4294966272 }
  0x24   :  { %3150 = dma.done.wait [#allocation6], 9216  }
  0x25   :  { %3151 = vsyncadd [#allocation6], 4294958080  ;;  %v3159_v0 = vmov 0.0   ;;  %vm3160_vm0 = vmmov 0   ;;  %v75_v1 = vld [vmem:[#allocation7 + $0x18] sm:$0xff]  ;;  %v74_v3 = vld [vmem:[#allocation7 + $0x10] sm:$0xff] }
  0x26   :  { %2772 = vmatprep.subr.mxu0 %v3159_v0  ;;  %2783 = vmatprep.subr.mxu1 %v3159_v0  ;;  %v83_v2 = vld [vmem:[#allocation7 + $0x58] sm:$0xff]  ;;  %v82_v4 = vld [vmem:[#allocation7 + $0x50] sm:$0xff]  ;;  %v73_v5 = vld [vmem:[#allocation7 + $0x8] sm:$0xff]  ;;  %vm136_vm1 = vcmask 261120   ;;  %vm1913_vm2 = vcmask 64512   ;;  %s3161_s0 = smov [#allocation8]  }
  0x27   :  { %2780 = vmatprep.mubr.msk.f32.mxu0 %vm3160_vm0, %v3159_v0  ;;  %2791 = vmatprep.mubr.msk.f32.mxu1 %vm3160_vm0, %v3159_v0  ;;  %v81_v6 = vld [vmem:[#allocation7 + $0x48] sm:$0xff]  ;;  %v72_v7 = vld [vmem:[#allocation7] sm:$0xff]  ;;  %v91_v11 = vld [vmem:[#allocation7 + $0x98] sm:$0xff]  ;;  %s2607_s2 = sshll.u32 %s3161_s0, 4  ;;  %s2608_s2 = int_to_ptr.vmem [resolvable:$true] %s2607_s2 }
  0x28   :  { %2773 = vmatpush3.msra.mxu0 %v75_v1  ;;  %2784 = vmatpush3.msra.mxu1 %v83_v2  ;;  %v80_v8 = vld [vmem:[#allocation7 + $0x40] sm:$0xff]  ;;  %v3212_v10 = vld [vmem:[#allocation2 + $0x8] sm:$0xff]  ;;  %v99_v12 = vld [vmem:[#allocation7 + $0xd8] sm:$0xff]  ;;  %s3128_s28 = scalar_lea.vmem %s2608_s2, 1024  ;;  %p3133_p2 = scmp.lt.s32.totalorder %s2608_s2, %s2608_s2 }
  0x29   :  { %2774 = vmatprep.subr.mxu0 %v3159_v0  ;;  %2785 = vmatprep.subr.mxu1 %v3159_v0  ;;  %v3210_v9 = vld [vmem:[#allocation2] sm:$0xff]  ;;  %v90_v13 = vld [vmem:[#allocation7 + $0x90] sm:$0xff]  ;;  %v89_v15 = vld [vmem:[#allocation7 + $0x88] sm:$0xff]  ;;  %p3129_p1 = scmp.ne.s32.totalorder %s2608_s2, %s3128_s28  ;;  %p3134_p3 = scmp.lt.s32.totalorder %s3128_s28, %s3128_s28 }
  0x2a   :  { %2775 = vmatpush3.msra.mxu0 %v74_v3  ;;  %2786 = vmatpush3.msra.mxu1 %v82_v4  ;;  %v98_v14 = vld [vmem:[#allocation7 + $0xd0] sm:$0xff]  ;;  %v97_v16 = vld [vmem:[#allocation7 + $0xc8] sm:$0xff]  ;;  %v88_v17 = vld [vmem:[#allocation7 + $0x80] sm:$0xff] }
  0x2b   :  { %2776 = vmatprep.subr.mxu0 %v3159_v0  ;;  %2787 = vmatprep.subr.mxu1 %v3159_v0  ;;  %v96_v18 = vld [vmem:[#allocation7 + $0xc0] sm:$0xff]  ;;  %v3228_v19 = vld [vmem:[#allocation2 + $0x10] sm:$0xff]  ;;  %v3230_v20 = vld [vmem:[#allocation2 + $0x18] sm:$0xff]  ;;  %p3135_p4 = por %p3134_p3, %p3133_p2 }
  0x2c   :  { %2777 = vmatpush3.msra.mxu0 %v73_v5  ;;  %2788 = vmatpush3.msra.mxu1 %v81_v6  ;;  %v107_v21 = vld [vmem:[#allocation7 + $0x118] sm:$0xff]  ;;  %v106_v23 = vld [vmem:[#allocation7 + $0x110] sm:$0xff]  ;;  %v105_v25 = vld [vmem:[#allocation7 + $0x108] sm:$0xff] }
  0x2d   :  { %2778 = vmatprep.subr.mxu0 %v3159_v0  ;;  %2789 = vmatprep.subr.mxu1 %v3159_v0  ;;  %v115_v22 = vld [vmem:[#allocation7 + $0x158] sm:$0xff]  ;;  %v114_v24 = vld [vmem:[#allocation7 + $0x150] sm:$0xff]  ;;  %v113_v26 = vld [vmem:[#allocation7 + $0x148] sm:$0xff]  ;;  %p3136_p5 = pnand %p3135_p4, %p3129_p1 }
  0x2e   :  { %2779 = vmatpush3.msra.mxu0 %v72_v7  ;;  %2790 = vmatpush3.msra.mxu1 %v80_v8  ;;  %v104_v27 = vld [vmem:[#allocation7 + $0x100] sm:$0xff]  ;;  %v3250_v30 = vld [vmem:[#allocation2 + $0x28] sm:$0xff]  ;;  %v123_v31 = vld [vmem:[#allocation7 + $0x198] sm:$0xff] }
  0x2f   :  { %2781 = vmatmul.mubr.msk.f32.vlgmr.msra.gmra.mxu0 %vm136_vm1, %v3210_v9  ;;  %2792 = vmatmul.mubr.msk.f32.vlgmr.msra.gmra.mxu1 %vm136_vm1, %v3212_v10  ;;  %v112_v28 = vld [vmem:[#allocation7 + $0x140] sm:$0xff]  ;;  %v131_v32 = vld [vmem:[#allocation7 + $0x1d8] sm:$0xff]  ;;  %v122_v33 = vld [vmem:[#allocation7 + $0x190] sm:$0xff] }
  0x30   :  { %2794 = vmatprep.subr.mxu0 %v3159_v0  ;;  %2805 = vmatprep.subr.mxu1 %v3159_v0  ;;  %v3248_v29 = vld [vmem:[#allocation2 + $0x20] sm:$0xff]  ;;  %v130_v34 = vld [vmem:[#allocation7 + $0x1d0] sm:$0xff]  ;;  %v121_v35 = vld [vmem:[#allocation7 + $0x188] sm:$0xff] }
  0x31   :  { %2795 = vmatpush3.msra.mxu0 %v91_v11  ;;  %2806 = vmatpush3.msra.mxu1 %v99_v12  ;;  %v129_v36 = vld [vmem:[#allocation7 + $0x1c8] sm:$0xff]  ;;  %v120_v37 = vld [vmem:[#allocation7 + $0x180] sm:$0xff]  ;;  %v3268_v39 = vld [vmem:[#allocation2 + $0x30] sm:$0xff] }
  0x32   :  { %2796 = vmatprep.subr.mxu0 %v3159_v0  ;;  %2807 = vmatprep.subr.mxu1 %v3159_v0  ;;  %v128_v38 = vld [vmem:[#allocation7 + $0x1c0] sm:$0xff]  ;;  %v3270_v40 = vld [vmem:[#allocation2 + $0x38] sm:$0xff]  ;;  %v78_v43 = vld [vmem:[#allocation7 + $0x30] sm:$0xff] }
  0x33   :  { %2797 = vmatpush3.msra.mxu0 %v90_v13  ;;  %2808 = vmatpush3.msra.mxu1 %v98_v14  ;;  %v79_v41 = vld [vmem:[#allocation7 + $0x38] sm:$0xff]  ;;  %v86_v44 = vld [vmem:[#allocation7 + $0x70] sm:$0xff]  ;;  %v77_v45 = vld [vmem:[#allocation7 + $0x28] sm:$0xff] }
  0x34   :  { %2798 = vmatprep.subr.mxu0 %v3159_v0  ;;  %2809 = vmatprep.subr.mxu1 %v3159_v0  ;;  %v87_v42 = vld [vmem:[#allocation7 + $0x78] sm:$0xff]  ;;  %v85_v46 = vld [vmem:[#allocation7 + $0x68] sm:$0xff]  ;;  %v76_v47 = vld [vmem:[#allocation7 + $0x20] sm:$0xff] }
  0x35   :  { %2799 = vmatpush3.msra.mxu0 %v89_v15  ;;  %2810 = vmatpush3.msra.mxu1 %v97_v16  ;;  %v84_v48 = vld [vmem:[#allocation7 + $0x60] sm:$0xff]  ;;  %v3290_v50 = vld [vmem:[#allocation5 + $0x8] sm:$0xff]  ;;  %v95_v51 = vld [vmem:[#allocation7 + $0xb8] sm:$0xff] }
  0x36   :  { %2800 = vmatprep.subr.mxu0 %v3159_v0  ;;  %2811 = vmatprep.subr.mxu1 %v3159_v0  ;;  %v3288_v49 = vld [vmem:[#allocation5] sm:$0xff]  ;;  %v103_v52 = vld [vmem:[#allocation7 + $0xf8] sm:$0xff]  ;;  %v94_v53 = vld [vmem:[#allocation7 + $0xb0] sm:$0xff] }
  0x37   :  { %2801 = vmatpush3.msra.mxu0 %v88_v17  ;;  %2802 = vmatprep.mubr.msk.f32.mxu0 %vm3160_vm0, %v3159_v0  ;;  %v102_v54 = vld [vmem:[#allocation7 + $0xf0] sm:$0xff]  ;;  %v93_v55 = vld [vmem:[#allocation7 + $0xa8] sm:$0xff]  ;;  %v92_v57 = vld [vmem:[#allocation7 + $0xa0] sm:$0xff] }
  0x38   :  { %2812 = vmatpush3.msra.mxu1 %v96_v18  ;;  %2813 = vmatprep.mubr.msk.f32.mxu1 %vm3160_vm0, %v3159_v0  ;;  %v101_v56 = vld [vmem:[#allocation7 + $0xe8] sm:$0xff]  ;;  %v100_v58 = vld [vmem:[#allocation7 + $0xe0] sm:$0xff]  ;;  %v3308_v59 = vld [vmem:[#allocation5 + $0x10] sm:$0xff] }
  0x39   :  { %2803 = vmatmul.mubr.msk.f32.vlgmr.msra.gmra.mxu0 %vm136_vm1, %v3228_v19  ;;  %2814 = vmatmul.mubr.msk.f32.vlgmr.msra.gmra.mxu1 %vm136_vm1, %v3230_v20  ;;  %v3310_v60 = vld [vmem:[#allocation5 + $0x18] sm:$0xff]  ;;  %v110_v63 = vld [vmem:[#allocation7 + $0x130] sm:$0xff]  ;;  %v109_v2 = vld [vmem:[#allocation7 + $0x128] sm:$0xff] }
  0x3a   :  { %2816 = vmatprep.subr.mxu0 %v3159_v0  ;;  %2827 = vmatprep.subr.mxu1 %v3159_v0  ;;  %v111_v61 = vld [vmem:[#allocation7 + $0x138] sm:$0xff]  ;;  %v118_v1 = vld [vmem:[#allocation7 + $0x170] sm:$0xff]  ;;  %v117_v3 = vld [vmem:[#allocation7 + $0x168] sm:$0xff] }
  0x3b   :  { %2817 = vmatpush3.msra.mxu0 %v107_v21  ;;  %2828 = vmatpush3.msra.mxu1 %v115_v22  ;;  %v119_v62 = vld [vmem:[#allocation7 + $0x178] sm:$0xff]  ;;  %v108_v4 = vld [vmem:[#allocation7 + $0x120] sm:$0xff]  ;;  %v3330_v7 = vld [vmem:[#allocation5 + $0x28] sm:$0xff] }
  0x3c   :  { %2818 = vmatprep.subr.mxu0 %v3159_v0  ;;  %2829 = vmatprep.subr.mxu1 %v3159_v0  ;;  %v116_v5 = vld [vmem:[#allocation7 + $0x160] sm:$0xff]  ;;  %v127_v8 = vld [vmem:[#allocation7 + $0x1b8] sm:$0xff]  ;;  %v126_v12 = vld [vmem:[#allocation7 + $0x1b0] sm:$0xff] }
  0x3d   :  { %2819 = vmatpush3.msra.mxu0 %v106_v23  ;;  %2830 = vmatpush3.msra.mxu1 %v114_v24  ;;  %v3328_v6 = vld [vmem:[#allocation5 + $0x20] sm:$0xff]  ;;  %v135_v11 = vld [vmem:[#allocation7 + $0x1f8] sm:$0xff]  ;;  %v134_v13 = vld [vmem:[#allocation7 + $0x1f0] sm:$0xff] }
  0x3e   :  { %2820 = vmatprep.subr.mxu0 %v3159_v0  ;;  %2831 = vmatprep.subr.mxu1 %v3159_v0  ;;  %v125_v14 = vld [vmem:[#allocation7 + $0x1a8] sm:$0xff]  ;;  %v124_v16 = vld [vmem:[#allocation7 + $0x1a0] sm:$0xff]  ;;  %v3348_v18 = vld [vmem:[#allocation5 + $0x30] sm:$0xff] }
  0x3f   :  { %2821 = vmatpush3.msra.mxu0 %v105_v25  ;;  %2832 = vmatpush3.msra.mxu1 %v113_v26  ;;  %v133_v15 = vld [vmem:[#allocation7 + $0x1e8] sm:$0xff]  ;;  %v132_v17 = vld [vmem:[#allocation7 + $0x1e0] sm:$0xff]  ;;  %v3350_v21 = vld [vmem:[#allocation5 + $0x38] sm:$0xff] }
  0x40   :  { %2822 = vmatprep.subr.mxu0 %v3159_v0  ;;  %2833 = vmatprep.subr.mxu1 %v3159_v0 }
  0x41   :  { %2823 = vmatpush3.msra.mxu0 %v104_v27  ;;  %2824 = vmatprep.mubr.msk.f32.mxu0 %vm3160_vm0, %v3159_v0 }
  0x42   :  { %2834 = vmatpush3.msra.mxu1 %v112_v28  ;;  %2835 = vmatprep.mubr.msk.f32.mxu1 %vm3160_vm0, %v3159_v0 }
  0x43   :  { %2825 = vmatmul.mubr.msk.f32.vlgmr.msra.gmra.mxu0 %vm136_vm1, %v3248_v29  ;;  %2836 = vmatmul.mubr.msk.f32.vlgmr.msra.gmra.mxu1 %vm136_vm1, %v3250_v30 }
  0x44   :  { %2838 = vmatprep.subr.mxu0 %v3159_v0  ;;  %2849 = vmatprep.subr.mxu1 %v3159_v0 }
  0x45   :  { %2839 = vmatpush3.msra.mxu0 %v123_v31  ;;  %2850 = vmatpush3.msra.mxu1 %v131_v32 }
  0x46   :  { %2840 = vmatprep.subr.mxu0 %v3159_v0  ;;  %2851 = vmatprep.subr.mxu1 %v3159_v0 }
  0x47   :  { %2841 = vmatpush3.msra.mxu0 %v122_v33  ;;  %2852 = vmatpush3.msra.mxu1 %v130_v34 }
  0x48   :  { %2842 = vmatprep.subr.mxu0 %v3159_v0  ;;  %2853 = vmatprep.subr.mxu1 %v3159_v0 }
  0x49   :  { %2843 = vmatpush3.msra.mxu0 %v121_v35  ;;  %2854 = vmatpush3.msra.mxu1 %v129_v36 }
  0x4a   :  { %2844 = vmatprep.subr.mxu0 %v3159_v0  ;;  %2855 = vmatprep.subr.mxu1 %v3159_v0 }
  0x4b   :  { %2845 = vmatpush3.msra.mxu0 %v120_v37  ;;  %2846 = vmatprep.mubr.msk.f32.mxu0 %vm3160_vm0, %v3159_v0 }
  0x4c   :  { %2856 = vmatpush3.msra.mxu1 %v128_v38  ;;  %2857 = vmatprep.mubr.msk.f32.mxu1 %vm3160_vm0, %v3159_v0 }
  0x4d   :  { %2847 = vmatmul.mubr.msk.f32.vlgmr.msra.gmra.mxu0 %vm136_vm1, %v3268_v39  ;;  %2858 = vmatmul.mubr.msk.f32.vlgmr.msra.gmra.mxu1 %vm136_vm1, %v3270_v40 }
  0x4e   :  { %2860 = vmatprep.subr.mxu0 %v3159_v0  ;;  %2871 = vmatprep.subr.mxu1 %v3159_v0 }
  0x4f   :  { %2861 = vmatpush3.msra.mxu0 %v79_v41  ;;  %2872 = vmatpush3.msra.mxu1 %v87_v42 }
  0x50   :  { %2862 = vmatprep.subr.mxu0 %v3159_v0  ;;  %2873 = vmatprep.subr.mxu1 %v3159_v0 }
  0x51   :  { %2863 = vmatpush3.msra.mxu0 %v78_v43  ;;  %2874 = vmatpush3.msra.mxu1 %v86_v44 }
  0x52   :  { %2864 = vmatprep.subr.mxu0 %v3159_v0  ;;  %2875 = vmatprep.subr.mxu1 %v3159_v0 }
  0x53   :  { %2865 = vmatpush3.msra.mxu0 %v77_v45  ;;  %2876 = vmatpush3.msra.mxu1 %v85_v46 }
  0x54   :  { %2866 = vmatprep.subr.mxu0 %v3159_v0  ;;  %2877 = vmatprep.subr.mxu1 %v3159_v0 }
  0x55   :  { %2867 = vmatpush3.msra.mxu0 %v76_v47  ;;  %2868 = vmatprep.mubr.msk.f32.mxu0 %vm3160_vm0, %v3159_v0 }
  0x56   :  { %2878 = vmatpush3.msra.mxu1 %v84_v48  ;;  %2879 = vmatprep.mubr.msk.f32.mxu1 %vm3160_vm0, %v3159_v0 }
  0x57   :  { %2869 = vmatmul.mubr.msk.f32.vlgmr.msra.gmra.mxu0 %vm136_vm1, %v3288_v49  ;;  %2880 = vmatmul.mubr.msk.f32.vlgmr.msra.gmra.mxu1 %vm136_vm1, %v3290_v50 }
  0x58   :  { %2882 = vmatprep.subr.mxu0 %v3159_v0  ;;  %2893 = vmatprep.subr.mxu1 %v3159_v0 }
  0x59   :  { %2883 = vmatpush3.msra.mxu0 %v95_v51  ;;  %2894 = vmatpush3.msra.mxu1 %v103_v52 }
  0x5a   :  { %2884 = vmatprep.subr.mxu0 %v3159_v0  ;;  %2895 = vmatprep.subr.mxu1 %v3159_v0 }
  0x5b   :  { %2885 = vmatpush3.msra.mxu0 %v94_v53  ;;  %2896 = vmatpush3.msra.mxu1 %v102_v54 }
  0x5c   :  { %2886 = vmatprep.subr.mxu0 %v3159_v0  ;;  %2897 = vmatprep.subr.mxu1 %v3159_v0 }
  0x5d   :  { %2887 = vmatpush3.msra.mxu0 %v93_v55  ;;  %2898 = vmatpush3.msra.mxu1 %v101_v56 }
  0x5e   :  { %2888 = vmatprep.subr.mxu0 %v3159_v0  ;;  %2899 = vmatprep.subr.mxu1 %v3159_v0 }
  0x5f   :  { %2889 = vmatpush3.msra.mxu0 %v92_v57  ;;  %2890 = vmatprep.mubr.msk.f32.mxu0 %vm3160_vm0, %v3159_v0 }
  0x60   :  { %2900 = vmatpush3.msra.mxu1 %v100_v58  ;;  %2901 = vmatprep.mubr.msk.f32.mxu1 %vm3160_vm0, %v3159_v0 }
  0x61   :  { %2891 = vmatmul.mubr.msk.f32.vlgmr.msra.gmra.mxu0 %vm136_vm1, %v3308_v59  ;;  %2902 = vmatmul.mubr.msk.f32.vlgmr.msra.gmra.mxu1 %vm136_vm1, %v3310_v60 }
  0x62   :  { %2904 = vmatprep.subr.mxu0 %v3159_v0  ;;  %2915 = vmatprep.subr.mxu1 %v3159_v0 }
  0x63   :  { %2905 = vmatpush3.msra.mxu0 %v111_v61  ;;  %2916 = vmatpush3.msra.mxu1 %v119_v62 }
  0x64   :  { %2906 = vmatprep.subr.mxu0 %v3159_v0  ;;  %2917 = vmatprep.subr.mxu1 %v3159_v0 }
  0x65   :  { %2907 = vmatpush3.msra.mxu0 %v110_v63  ;;  %2918 = vmatpush3.msra.mxu1 %v118_v1 }
  0x66   :  { %2908 = vmatprep.subr.mxu0 %v3159_v0  ;;  %2919 = vmatprep.subr.mxu1 %v3159_v0 }
  0x67   :  { %2909 = vmatpush3.msra.mxu0 %v109_v2  ;;  %2920 = vmatpush3.msra.mxu1 %v117_v3 }
  0x68   :  { %2910 = vmatprep.subr.mxu0 %v3159_v0  ;;  %2921 = vmatprep.subr.mxu1 %v3159_v0 }
  0x69   :  { %2911 = vmatpush3.msra.mxu0 %v108_v4  ;;  %2912 = vmatprep.mubr.msk.f32.mxu0 %vm3160_vm0, %v3159_v0 }
  0x6a   :  { %2922 = vmatpush3.msra.mxu1 %v116_v5  ;;  %2923 = vmatprep.mubr.msk.f32.mxu1 %vm3160_vm0, %v3159_v0 }
  0x6b   :  { %2913 = vmatmul.mubr.msk.f32.vlgmr.msra.gmra.mxu0 %vm136_vm1, %v3328_v6  ;;  %2924 = vmatmul.mubr.msk.f32.vlgmr.msra.gmra.mxu1 %vm136_vm1, %v3330_v7 }
  0x6c   :  { %2926 = vmatprep.subr.mxu0 %v3159_v0  ;;  %2937 = vmatprep.subr.mxu1 %v3159_v0 }
  0x6d   :  { %2927 = vmatpush3.msra.mxu0 %v127_v8  ;;  %2938 = vmatpush3.msra.mxu1 %v135_v11 }
  0x6e   :  { %2928 = vmatprep.subr.mxu0 %v3159_v0  ;;  %2939 = vmatprep.subr.mxu1 %v3159_v0 }
  0x6f   :  { %2929 = vmatpush3.msra.mxu0 %v126_v12  ;;  %2940 = vmatpush3.msra.mxu1 %v134_v13 }
  0x70   :  { %2930 = vmatprep.subr.mxu0 %v3159_v0  ;;  %2941 = vmatprep.subr.mxu1 %v3159_v0 }
  0x71   :  { %2931 = vmatpush3.msra.mxu0 %v125_v14  ;;  %2942 = vmatpush3.msra.mxu1 %v133_v15 }
  0x72   :  { %2932 = vmatprep.subr.mxu0 %v3159_v0  ;;  %2943 = vmatprep.subr.mxu1 %v3159_v0 }
  0x73   :  { %2933 = vmatpush3.msra.mxu0 %v124_v16  ;;  %2934 = vmatprep.mubr.msk.f32.mxu0 %vm3160_vm0, %v3159_v0 }
  0x74   :  { %2944 = vmatpush3.msra.mxu1 %v132_v17  ;;  %2945 = vmatprep.mubr.msk.f32.mxu1 %vm3160_vm0, %v3159_v0 }
  0x75   :  { %2935 = vmatmul.mubr.msk.f32.vlgmr.msra.gmra.mxu0 %vm136_vm1, %v3348_v18  ;;  %2946 = vmatmul.mubr.msk.f32.vlgmr.msra.gmra.mxu1 %vm136_vm1, %v3350_v21 }
  0x76   :  { %2948 = vmatprep.subr.mxu0 %v3159_v0  ;;  %2953 = vmatprep.subr.mxu1 %v3159_v0 }
  0x77   :  { %2950 = vmatprep.mubr.msk.f32.mxu0 %vm3160_vm0, %v3159_v0  ;;  %2955 = vmatprep.mubr.msk.f32.mxu1 %vm3160_vm0, %v3159_v0 }
  0xef   :  { %v206_v22 = vpop.f32.mrf.mxu0  ;;  %v279_v23 = vpop.f32.mrf.mxu1 }
  0xf1   :  { %v2782_v24 = vpop.f32.mrf.mxu0  ;;  %v2793_v25 = vpop.f32.mrf.mxu1 }
  0xf9   :  { %v352_v26 = vpop.f32.mrf.mxu0  ;;  %v425_v27 = vpop.f32.mrf.mxu1 }
  0xfb   :  { %v2804_v28 = vpop.f32.mrf.mxu0  ;;  %v2815_v31 = vpop.f32.mrf.mxu1 }
 0x103   :  { %v498_v32 = vpop.f32.mrf.mxu0  ;;  %v571_v33 = vpop.f32.mrf.mxu1 }
 0x105   :  { %v2826_v34 = vpop.f32.mrf.mxu0  ;;  %v2837_v35 = vpop.f32.mrf.mxu1 }
 0x10d   :  { %v644_v36 = vpop.f32.mrf.mxu0  ;;  %v717_v37 = vpop.f32.mrf.mxu1 }
 0x10f   :  { %v2848_v38 = vpop.f32.mrf.mxu0  ;;  %v2859_v41 = vpop.f32.mrf.mxu1 }
 0x117   :  { %v790_v42 = vpop.f32.mrf.mxu0  ;;  %v863_v43 = vpop.f32.mrf.mxu1 }
 0x118   :  { %2949 = vmatpush3.xpose.msk.msra.mxu0 %vm136_vm1, %v790_v42  ;;  %2954 = vmatpush3.xpose.msk.msra.mxu1 %vm136_vm1, %v863_v43 }
 0x119   :  { %v2870_v44 = vpop.f32.mrf.mxu0  ;;  %v2881_v45 = vpop.f32.mrf.mxu1  ;;  %2958 = vmatprep.subr.mxu0 %v3159_v0  ;;  %2963 = vmatprep.subr.mxu1 %v3159_v0 }
 0x11b   :  { %2951 = vmatmul.mubr.msk.f32.vlgmr.msra.gmra.mxu0 %vm136_vm1, %v206_v22  ;;  %2956 = vmatmul.mubr.msk.f32.vlgmr.msra.gmra.mxu1 %vm136_vm1, %v279_v23 }
 0x11c   :  { %2960 = vmatprep.mubr.msk.f32.mxu0 %vm3160_vm0, %v3159_v0  ;;  %2965 = vmatprep.mubr.msk.f32.mxu1 %vm3160_vm0, %v3159_v0 }
 0x121   :  { %v936_v46 = vpop.f32.mrf.mxu0  ;;  %v1009_v47 = vpop.f32.mrf.mxu1 }
 0x122   :  { %2959 = vmatpush3.xpose.msk.msra.mxu0 %vm136_vm1, %v936_v46  ;;  %2964 = vmatpush3.xpose.msk.msra.mxu1 %vm136_vm1, %v1009_v47 }
 0x123   :  { %v2892_v48 = vpop.f32.mrf.mxu0  ;;  %v2903_v51 = vpop.f32.mrf.mxu1  ;;  %2968 = vmatprep.subr.mxu0 %v3159_v0  ;;  %2973 = vmatprep.subr.mxu1 %v3159_v0 }
 0x125   :  { %2961 = vmatmul.mubr.msk.f32.vlgmr.msra.gmra.mxu0 %vm136_vm1, %v352_v26  ;;  %2966 = vmatmul.mubr.msk.f32.vlgmr.msra.gmra.mxu1 %vm136_vm1, %v425_v27 }
 0x126   :  { %2970 = vmatprep.mubr.msk.f32.mxu0 %vm3160_vm0, %v3159_v0  ;;  %2975 = vmatprep.mubr.msk.f32.mxu1 %vm3160_vm0, %v3159_v0 }
 0x12b   :  { %v1082_v52 = vpop.f32.mrf.mxu0  ;;  %v1155_v53 = vpop.f32.mrf.mxu1 }
 0x12c   :  { %2969 = vmatpush3.xpose.msk.msra.mxu0 %vm136_vm1, %v1082_v52  ;;  %2974 = vmatpush3.xpose.msk.msra.mxu1 %vm136_vm1, %v1155_v53 }
 0x12d   :  { %v2914_v54 = vpop.f32.mrf.mxu0  ;;  %v2925_v55 = vpop.f32.mrf.mxu1  ;;  %2978 = vmatprep.subr.mxu0 %v3159_v0  ;;  %2983 = vmatprep.subr.mxu1 %v3159_v0 }
 0x12f   :  { %2971 = vmatmul.mubr.msk.f32.vlgmr.msra.gmra.mxu0 %vm136_vm1, %v498_v32  ;;  %2976 = vmatmul.mubr.msk.f32.vlgmr.msra.gmra.mxu1 %vm136_vm1, %v571_v33 }
 0x130   :  { %2980 = vmatprep.mubr.msk.f32.mxu0 %vm3160_vm0, %v3159_v0  ;;  %2985 = vmatprep.mubr.msk.f32.mxu1 %vm3160_vm0, %v3159_v0 }
 0x135   :  { %v1228_v56 = vpop.f32.mrf.mxu0  ;;  %v1301_v57 = vpop.f32.mrf.mxu1 }
 0x136   :  { %2979 = vmatpush3.xpose.msk.msra.mxu0 %vm136_vm1, %v1228_v56  ;;  %2984 = vmatpush3.xpose.msk.msra.mxu1 %vm136_vm1, %v1301_v57 }
 0x137   :  { %v2936_v58 = vpop.f32.mrf.mxu0  ;;  %v2947_v61 = vpop.f32.mrf.mxu1  ;;  %2988 = vmatprep.subr.mxu0 %v3159_v0  ;;  %2993 = vmatprep.subr.mxu1 %v3159_v0 }
 0x139   :  { %2981 = vmatmul.mubr.msk.f32.vlgmr.msra.gmra.mxu0 %vm136_vm1, %v644_v36  ;;  %2986 = vmatmul.mubr.msk.f32.vlgmr.msra.gmra.mxu1 %vm136_vm1, %v717_v37 }
 0x13a   :  { %2989 = vmatpush3.msra.mxu0 %v3288_v49  ;;  %2990 = vmatprep.mubr.msk.f32.mxu0 %vm3160_vm0, %v3159_v0 }
 0x13b   :  { %2994 = vmatpush3.msra.mxu1 %v3290_v50  ;;  %2995 = vmatprep.mubr.msk.f32.mxu1 %vm3160_vm0, %v3159_v0 }
 0x13c   :  { %2998 = vmatprep.subr.mxu0 %v3159_v0  ;;  %3003 = vmatprep.subr.mxu1 %v3159_v0 }
 0x1db   :  { %v1377_v62 = vpop.f32.mrf.mxu0  ;;  %v1453_v63 = vpop.f32.mrf.mxu1 }
 0x1dc   :  { %v1914_v1 = vsel %vm1913_vm2, %v1377_v62, -inf  ;;  %v1917_v3 = vsel %vm1913_vm2, %v1453_v63, -inf }
 0x1dd   :  { %v2957_v2 = vpop.f32.mrf.mxu1  ;;  %1915 = vmax.xlane.f32.xlu0 %v1914_v1  ;;  %v2952_v49 = vpop.f32.mrf.mxu0 }
 0x1e1   :  { %1918 = vmax.xlane.f32.xlu0 %v1917_v3 }
 0x1e5   :  { %v1529_v4 = vpop.f32.mrf.mxu0  ;;  %v1605_v50 = vpop.f32.mrf.mxu1 }
 0x1e6   :  { %v1920_v5 = vsel %vm1913_vm2, %v1529_v4, -inf  ;;  %v1923_v12 = vsel %vm1913_vm2, %v1605_v50, -inf }
 0x1e7   :  { %v2967_v8 = vpop.f32.mrf.mxu1  ;;  %1921 = vmax.xlane.f32.xlu1 %v1920_v5  ;;  %v2962_v11 = vpop.f32.mrf.mxu0 }
 0x1eb   :  { %1924 = vmax.xlane.f32.xlu1 %v1923_v12 }
 0x1ef   :  { %v1681_v13 = vpop.f32.mrf.mxu0  ;;  %v1757_v14 = vpop.f32.mrf.mxu1 }
 0x1f0   :  { %v1929_v15 = vsel %vm1913_vm2, %v1757_v14, -inf  ;;  %v1926_v16 = vsel %vm1913_vm2, %v1681_v13, -inf }
 0x1f1   :  { %v2977_v17 = vpop.f32.mrf.mxu1  ;;  %1930 = vmax.xlane.f32.xlu1 %v1929_v15  ;;  %1927 = vmax.xlane.f32.xlu0 %v1926_v16  ;;  %v2972_v22 = vpop.f32.mrf.mxu0 }
 0x1f9   :  { %v1833_v23 = vpop.f32.mrf.mxu0  ;;  %v1909_v24 = vpop.f32.mrf.mxu1 }
 0x1fa   :  { %v1935_v25 = vsel %vm1913_vm2, %v1909_v24, -inf  ;;  %v1932_v26 = vsel %vm1913_vm2, %v1833_v23, -inf }
 0x1fb   :  { %v2987_v27 = vpop.f32.mrf.mxu1  ;;  %1936 = vmax.xlane.f32.xlu1 %v1935_v25  ;;  %1933 = vmax.xlane.f32.xlu0 %v1932_v26  ;;  %v2982_v28 = vpop.f32.mrf.mxu0 }
 0x266   :  { %v1916_v31 = vpop.xlane.xlu0 %1915 }
 0x267   :  { %v1938_v32 = vsub.f32 %v1377_v62, %v1916_v31 }
 0x269   :  { %v1946_v33 = vmul.f32 1.442695, %v1938_v32 }
 0x26a   :  { %v1919_v34 = vpop.xlane.xlu0 %1918 }
 0x26b   :  { %3036 = vpow2.f32 %v1946_v33  ;;  %v1939_v35 = vsub.f32 %v1453_v63, %v1919_v34 }
 0x26d   :  { %v1948_v36 = vmul.f32 1.442695, %v1939_v35 }
 0x26f   :  { %3038 = vpow2.f32 %v1948_v36 }
 0x270   :  { %v1922_v37 = vpop.xlane.xlu1 %1921 }
 0x271   :  { %v1940_v38 = vsub.f32 %v1529_v4, %v1922_v37 }
 0x273   :  { %v1950_v41 = vmul.f32 1.442695, %v1940_v38 }
 0x274   :  { %v1925_v42 = vpop.xlane.xlu1 %1924 }
 0x275   :  { %3040 = vpow2.f32 %v1950_v41  ;;  %v1941_v43 = vsub.f32 %v1605_v50, %v1925_v42 }
 0x277   :  { %v1952_v44 = vmul.f32 1.442695, %v1941_v43 }
 0x278   :  { %v3037_v45 = vpop.eup %3036 }
 0x279   :  { %3042 = vpow2.f32 %v1952_v44  ;;  %v1962_v46 = vsel %vm1913_vm2, %v3037_v45, 0.0 }
 0x27a   :  { %v1931_v47 = vpop.xlane.xlu1 %1930  ;;  %v1928_v48 = vpop.xlane.xlu0 %1927  ;;  %1963 = vadd.xlane.f32.xlu0 %v1962_v46 }
 0x27b   :  { %v1943_v51 = vsub.f32 %v1757_v14, %v1931_v47  ;;  %v1942_v52 = vsub.f32 %v1681_v13, %v1928_v48 }
 0x27c   :  { %v3039_v53 = vpop.eup %3038 }
 0x27d   :  { %v1956_v54 = vmul.f32 1.442695, %v1943_v51  ;;  %v1954_v55 = vmul.f32 1.442695, %v1942_v52  ;;  %v1965_v56 = vsel %vm1913_vm2, %v3039_v53, 0.0 }
 0x27e   :  { %1966 = vadd.xlane.f32.xlu1 %v1965_v56 }
 0x27f   :  { %3044 = vpow2.f32 %v1956_v54 }
 0x280   :  { %3046 = vpow2.f32 %v1954_v55 }
 0x282   :  { %v3041_v57 = vpop.eup %3040 }
 0x283   :  { %v1968_v58 = vsel %vm1913_vm2, %v3041_v57, 0.0 }
 0x284   :  { %v1937_v61 = vpop.xlane.xlu1 %1936  ;;  %v1934_v62 = vpop.xlane.xlu0 %1933  ;;  %1969 = vadd.xlane.f32.xlu0 %v1968_v58 }
 0x285   :  { %v1945_v63 = vsub.f32 %v1909_v24, %v1937_v61  ;;  %v1944_v1 = vsub.f32 %v1833_v23, %v1934_v62 }
 0x286   :  { %v3043_v2 = vpop.eup %3042 }
 0x287   :  { %v1960_v49 = vmul.f32 1.442695, %v1945_v63  ;;  %v1958_v3 = vmul.f32 1.442695, %v1944_v1  ;;  %v1971_v4 = vsel %vm1913_vm2, %v3043_v2, 0.0 }
 0x288   :  { %1972 = vadd.xlane.f32.xlu1 %v1971_v4 }
 0x289   :  { %3048 = vpow2.f32 %v1960_v49 }
 0x28a   :  { %3050 = vpow2.f32 %v1958_v3 }
 0x28c   :  { %v3045_v50 = vpop.eup %3044 }
 0x28d   :  { %v3047_v5 = vpop.eup %3046  ;;  %v1977_v8 = vsel %vm1913_vm2, %v3045_v50, 0.0 }
 0x28e   :  { %1978 = vadd.xlane.f32.xlu1 %v1977_v8  ;;  %v1974_v11 = vsel %vm1913_vm2, %v3047_v5, 0.0 }
 0x28f   :  { %1975 = vadd.xlane.f32.xlu0 %v1974_v11 }
 0x296   :  { %v3049_v12 = vpop.eup %3048 }
 0x297   :  { %v3051_v13 = vpop.eup %3050  ;;  %v1983_v14 = vsel %vm1913_vm2, %v3049_v12, 0.0 }
 0x298   :  { %1984 = vadd.xlane.f32.xlu1 %v1983_v14  ;;  %v1980_v15 = vsel %vm1913_vm2, %v3051_v13, 0.0 }
 0x299   :  { %1981 = vadd.xlane.f32.xlu0 %v1980_v15 }
 0x303   :  { %v1964_v16 = vpop.xlane.xlu0 %1963 }
 0x304   :  { %3052 = vrcp.f32 %v1964_v16 }
 0x307   :  { %v1967_v17 = vpop.xlane.xlu1 %1966 }
 0x308   :  { %3054 = vrcp.f32 %v1967_v17 }
 0x30d   :  { %v1970_v22 = vpop.xlane.xlu0 %1969 }
 0x30e   :  { %3056 = vrcp.f32 %v1970_v22 }
 0x311   :  { %v3053_v23 = vpop.eup %3052  ;;  %v1973_v24 = vpop.xlane.xlu1 %1972 }
 0x312   :  { %3058 = vrcp.f32 %v1973_v24  ;;  %v1987_v25 = vmul.f32 %v3053_v23, %v3037_v45 }
 0x314   :  { %2991 = vmatmul.mubr.msk.f32.vlgmr.msra.gmra.mxu0 %vm1913_vm2, %v1987_v25 }
 0x315   :  { %v3055_v26 = vpop.eup %3054  ;;  %2999 = vmatpush3.msra.mxu0 %v3308_v59  ;;  %3000 = vmatprep.mubr.msk.f32.mxu0 %vm3160_vm0, %v3159_v0 }
 0x316   :  { %v1989_v27 = vmul.f32 %v3055_v26, %v3039_v53  ;;  %3008 = vmatprep.subr.mxu0 %v3159_v0 }
 0x317   :  { %v1979_v28 = vpop.xlane.xlu1 %1978 }
 0x318   :  { %3060 = vrcp.f32 %v1979_v28  ;;  %v1976_v31 = vpop.xlane.xlu0 %1975  ;;  %2996 = vmatmul.mubr.msk.f32.vlgmr.msra.gmra.mxu1 %vm1913_vm2, %v1989_v27 }
 0x319   :  { %3062 = vrcp.f32 %v1976_v31  ;;  %3004 = vmatpush3.msra.mxu1 %v3310_v60  ;;  %3005 = vmatprep.mubr.msk.f32.mxu1 %vm3160_vm0, %v3159_v0 }
 0x31a   :  { %3013 = vmatprep.subr.mxu1 %v3159_v0 }
 0x31b   :  { %v3057_v59 = vpop.eup %3056 }
 0x31c   :  { %v1991_v32 = vmul.f32 %v3057_v59, %v3041_v57 }
 0x31e   :  { %3001 = vmatmul.mubr.msk.f32.vlgmr.msra.gmra.mxu0 %vm1913_vm2, %v1991_v32 }
 0x31f   :  { %v3059_v33 = vpop.eup %3058  ;;  %3009 = vmatpush3.msra.mxu0 %v3328_v6  ;;  %3010 = vmatprep.mubr.msk.f32.mxu0 %vm3160_vm0, %v3159_v0 }
 0x320   :  { %v1993_v34 = vmul.f32 %v3059_v33, %v3043_v2  ;;  %3018 = vmatprep.subr.mxu0 %v3159_v0 }
 0x321   :  { %v1985_v35 = vpop.xlane.xlu1 %1984 }
 0x322   :  { %3064 = vrcp.f32 %v1985_v35  ;;  %v1982_v60 = vpop.xlane.xlu0 %1981  ;;  %3006 = vmatmul.mubr.msk.f32.vlgmr.msra.gmra.mxu1 %vm1913_vm2, %v1993_v34 }
 0x323   :  { %3066 = vrcp.f32 %v1982_v60  ;;  %3014 = vmatpush3.msra.mxu1 %v3330_v7  ;;  %3015 = vmatprep.mubr.msk.f32.mxu1 %vm3160_vm0, %v3159_v0 }
 0x324   :  { %3023 = vmatprep.subr.mxu1 %v3159_v0 }
 0x325   :  { %v3061_v6 = vpop.eup %3060 }
 0x326   :  { %v3063_v36 = vpop.eup %3062  ;;  %v1997_v37 = vmul.f32 %v3061_v6, %v3045_v50 }
 0x327   :  { %v1995_v38 = vmul.f32 %v3063_v36, %v3047_v5 }
 0x328   :  { %3016 = vmatmul.mubr.msk.f32.vlgmr.msra.gmra.mxu1 %vm1913_vm2, %v1997_v37 }
 0x329   :  { %3011 = vmatmul.mubr.msk.f32.vlgmr.msra.gmra.mxu0 %vm1913_vm2, %v1995_v38  ;;  %3024 = vmatpush3.msra.mxu1 %v3350_v21 }
 0x32a   :  { %3019 = vmatpush3.msra.mxu0 %v3348_v18  ;;  %3020 = vmatprep.mubr.msk.f32.mxu0 %vm3160_vm0, %v3159_v0 }
 0x32b   :  { %3025 = vmatprep.mubr.msk.f32.mxu1 %vm3160_vm0, %v3159_v0 }
 0x32f   :  { %v3065_v7 = vpop.eup %3064 }
 0x330   :  { %v3067_v41 = vpop.eup %3066  ;;  %v2001_v42 = vmul.f32 %v3065_v7, %v3049_v12 }
 0x331   :  { %v1999_v43 = vmul.f32 %v3067_v41, %v3051_v13 }
 0x332   :  { %3026 = vmatmul.mubr.msk.f32.vlgmr.msra.gmra.mxu1 %vm1913_vm2, %v2001_v42 }
 0x333   :  { %3021 = vmatmul.mubr.msk.f32.vlgmr.msra.gmra.mxu0 %vm1913_vm2, %v1999_v43 }
 0x3d4   :  { %v2071_v44 = vpop.f32.mrf.mxu0 }
 0x3d5   :  { %v2586_v45 = vadd.f32 %v2071_v44, %v3210_v9 }
 0x3d6   :  { %v2992_v21 = vpop.f32.mrf.mxu0 }
 0x3d7   :  { %2594 = vst.msk [vmem:[#allocation8] sm:$0xff] %vm136_vm1, %v2586_v45 }
 0x3d8   :  { %v2144_v18 = vpop.f32.mrf.mxu1 }
 0x3d9   :  { %v2587_v46 = vadd.f32 %v2144_v18, %v3212_v10 }
 0x3da   :  { %v2997_v47 = vpop.f32.mrf.mxu1 }
 0x3db   :  { %2595 = vst.msk [vmem:[#allocation8 + $0x8] sm:$0xff] %vm136_vm1, %v2587_v46 }
 0x3de   :  { %v2217_v0 = vpop.f32.mrf.mxu0 }
 0x3df   :  { %v2588_v48 = vadd.f32 %v2217_v0, %v3228_v19 }
 0x3e0   :  { %v3002_v51 = vpop.f32.mrf.mxu0 }
 0x3e1   :  { %2596 = vst.msk [vmem:[#allocation8 + $0x10] sm:$0xff] %vm136_vm1, %v2588_v48 }
 0x3e2   :  { %v2290_v52 = vpop.f32.mrf.mxu1 }
 0x3e3   :  { %v2589_v53 = vadd.f32 %v2290_v52, %v3230_v20 }
 0x3e4   :  { %v3007_v54 = vpop.f32.mrf.mxu1 }
 0x3e5   :  { %2597 = vst.msk [vmem:[#allocation8 + $0x18] sm:$0xff] %vm136_vm1, %v2589_v53 }
 0x3e8   :  { %v2436_v9 = vpop.f32.mrf.mxu1 }
 0x3e9   :  { %v2363_v55 = vpop.f32.mrf.mxu0  ;;  %v2591_v56 = vadd.f32 %v2436_v9, %v3250_v30 }
 0x3ea   :  { %v2590_v10 = vadd.f32 %v2363_v55, %v3248_v29  ;;  %v3017_v57 = vpop.f32.mrf.mxu1 }
 0x3eb   :  { %2599 = vst.msk [vmem:[#allocation8 + $0x28] sm:$0xff] %vm136_vm1, %v2591_v56  ;;  %v3012_v58 = vpop.f32.mrf.mxu0 }
 0x3ec   :  { %2598 = vst.msk [vmem:[#allocation8 + $0x20] sm:$0xff] %vm136_vm1, %v2590_v10 }
 0x3f2   :  { %v2582_v19 = vpop.f32.mrf.mxu1 }
 0x3f3   :  { %v2509_v61 = vpop.f32.mrf.mxu0  ;;  %v2593_v20 = vadd.f32 %v2582_v19, %v3270_v40 }
 0x3f4   :  { %v2592_v62 = vadd.f32 %v2509_v61, %v3268_v39  ;;  %v3027_v63 = vpop.f32.mrf.mxu1 }
 0x3f5   :  { %2601 = vst.msk [vmem:[#allocation8 + $0x38] sm:$0xff] %vm136_vm1, %v2593_v20  ;;  %v3022_v30 = vpop.f32.mrf.mxu0 }
 0x3f6   :  { %2600 = vst.msk [vmem:[#allocation8 + $0x30] sm:$0xff] %vm136_vm1, %v2592_v62 }
 0x3f7   :  { %3139 = shalt.err (!%p3136_p5)
}
 0x3f8   :  { %2613 = dma.vmem_to_hbm [thread:$0]  %s2608_s2, 1024, %s3481_s3, [#allocation4], %s3156_s17, %s3156_s17, %s3157_s18  }
 0x3f9   :  { %3152 = dma.done.wait [#allocation4], 1024  }
 0x3fa   :  { %3153 = vsyncadd [#allocation4], 4294966272 }
 0x3fb   :  { %2617 = vsyncpa [#allocation3], 1 }
 0x3fc   :  { %2618 = vsyncpa [#allocation6], 1 }
 0x3fd   :  { %2619 = vsyncpa [#allocation4], 1 }

</bundles_post_ra>
